<compile_context>
chip_gen: v5e
topology: v5e:2x2
jax: 0.10.0
libtpu: 0.0.40
codegen_flags: <defaults>
</compile_context>

<pallas_src>
import functools

import jax
import jax.numpy as jnp
import numpy as np
from jax.experimental import pallas as pl
from jax.experimental.pallas import tpu as pltpu

# ----------------------------- configuration -------------------------------
HIDDEN_DIM = 32
N_LAYERS = 3          # 1 input layer, (N_LAYERS-1) hidden blocks, 1 output layer
BN_EPS = 1e-5
BATCH = 64
MAX_TILE_B = 16384    # lanes per grid step (multiple of 128)

# feature dims: R(1) inv_r(1) dr(3) dot(3) cross(9) cross_norm(3) rel_orient(9)
#               align(6) project(18) rbf(6) angle(1)  -> 60
IN_DIM = 60


# ---------------- reference featurizers (batch-first, plain JAX) -----------
def dot_product(R1, R2):
    return jnp.sum(R1 * R2, axis=2)                        # (B, 3)


def cross_product(R1, R2):
    cross = jnp.cross(R1, R2, axis=-1)                     # (B, 3, 3)
    norm = jnp.linalg.norm(cross, axis=2)                  # (B, 3)
    return cross, norm


def relative_orientation(R1, R2):
    return jnp.einsum('bji,bjk->bik', R1, R2)              # (B, 3, 3)


def rel_pos_orientation(dr, R1, R2):
    align1 = jnp.einsum('bi,bij->bj', dr, R1)              # (B, 3)
    align2 = jnp.einsum('bi,bij->bj', dr, R2)              # (B, 3)
    align = jnp.concatenate([align1, align2], axis=1)      # (B, 6)
    proj1 = align1[:, :, None] * jnp.transpose(R1, (0, 2, 1))
    proj2 = align2[:, :, None] * jnp.transpose(R2, (0, 2, 1))
    project = jnp.concatenate([proj1, proj2], axis=1)      # (B, 6, 3)
    return align, project


def RBF_rel_pos(dr, R1, R2):
    align1 = jnp.einsum('bi,bij->bj', dr, R1)
    align2 = jnp.einsum('bi,bij->bj', dr, R2)
    a = jnp.concatenate([align1, align2], axis=1)          # (B, 6)
    return jnp.exp(-jnp.square(a))


def rot_matrix_to_angle(rel_orient):
    tr = rel_orient[:, 0, 0] + rel_orient[:, 1, 1] + rel_orient[:, 2, 2]
    c = jnp.clip((tr - 1.0) * 0.5, -1.0, 1.0)
    return jnp.arccos(c)[:, None]                          # (B, 1)


def prep_features_rot_matrix(x1, x2, R1, R2):
    """Module-faithful (B, 60) f32 feature prep -- used by the reference path."""
    batch_size = x1.shape[0]
    dr = x1 - x2
    R = jnp.linalg.norm(dr, axis=1, keepdims=True)         # (B, 1)
    # NOTE: coincident pairs (R == 0) produce Inf/NaN, exactly as the module does.
    dr = dr / R
    inv_r = 1.0 / R
    orient_dot_prod = dot_product(R1, R2)
    orient_cross_prod, orient_cross_prod_norm = cross_product(R1, R2)
    rel_orient = relative_orientation(R1, R2)
    rel_pos_align, rel_pos_project = rel_pos_orientation(dr, R1, R2)
    rbf = RBF_rel_pos(dr, R1, R2)
    angle = rot_matrix_to_angle(rel_orient)
    features = jnp.concatenate(
        (R, inv_r, dr, orient_dot_prod,
         orient_cross_prod.reshape(batch_size, -1), orient_cross_prod_norm,
         rel_orient.reshape(batch_size, -1), rel_pos_align,
         rel_pos_project.reshape(batch_size, -1), rbf, angle), axis=1)
    return features.astype(jnp.float32)


# -------- transposed feature prep: (60, B) layout, batch on lanes, bf16 ----
def prep_features_t(x1, x2, R1, R2):
    """Same features as prep_features_rot_matrix, emitted as (60, B) bfloat16."""
    B = x1.shape[0]
    x1t, x2t = x1.T, x2.T                                  # (3, B)
    drt = x1t - x2t
    R = jnp.sqrt(jnp.sum(drt * drt, axis=0, keepdims=True))   # (1, B)
    inv_r = 1.0 / R
    drt = drt * inv_r                                      # normalized (3, B)

    # orientation frames with batch last: R1t[p, q, b] = R1[b, p, q]
    R1t = jnp.transpose(R1, (1, 2, 0))                     # (3, 3, B)
    R2t = jnp.transpose(R2, (1, 2, 0))

    dot = jnp.sum(R1t * R2t, axis=1)                       # (3, B)
    cross = jnp.cross(R1t, R2t, axis=1)                    # (3, 3, B) [i, c, b]
    cross_norm = jnp.sqrt(jnp.sum(cross * cross, axis=1))  # (3, B)
    rel_orient = jnp.einsum('jib,jkb->ikb', R1t, R2t)      # (3, 3, B) [i, k, b]

    align1 = jnp.einsum('ib,ijb->jb', drt, R1t)            # (3, B)
    align2 = jnp.einsum('ib,ijb->jb', drt, R2t)            # (3, B)
    align = jnp.concatenate([align1, align2], axis=0)      # (6, B)
    proj1 = align1[:, None, :] * jnp.transpose(R1t, (1, 0, 2))   # (3, 3, B)
    proj2 = align2[:, None, :] * jnp.transpose(R2t, (1, 0, 2))   # (3, 3, B)
    project = jnp.concatenate([proj1, proj2], axis=0)      # (6, 3, B)
    rbf = jnp.exp(-jnp.square(align))                      # (6, B)

    tr = rel_orient[0, 0] + rel_orient[1, 1] + rel_orient[2, 2]
    angle = jnp.arccos(jnp.clip((tr - 1.0) * 0.5, -1.0, 1.0))[None, :]   # (1, B)

    feats_t = jnp.concatenate(
        (R, inv_r, drt, dot, cross.reshape(9, B), cross_norm,
         rel_orient.reshape(9, B), align, project.reshape(18, B), rbf, angle),
        axis=0)                                            # (60, B)
    return feats_t.astype(jnp.bfloat16)


# ------------------------- deterministic parameter init --------------------
def init_params(key, in_dim, hidden, n_layers):
    ks = iter(jax.random.split(key, 8 * n_layers + 8))

    def xavier(fin, fout):
        lim = float(np.sqrt(6.0 / (fin + fout)))
        return jax.random.uniform(next(ks), (fin, fout), jnp.float32, -lim, lim)

    p = {
        'w_in': xavier(in_dim, hidden),
        'b_in': jnp.full((1, hidden), 0.01, jnp.float32),
        'mids': [],
        'w_out': xavier(hidden, 1),
        'b_out': jnp.full((1, 1), 0.01, jnp.float32),
    }
    for _ in range(n_layers - 1):
        p['mids'].append(dict(
            w=xavier(hidden, hidden),
            b=jnp.full((1, hidden), 0.01, jnp.float32),
            gamma=1.0 + 0.1 * jax.random.normal(next(ks), (1, hidden), jnp.float32),
            beta=0.1 * jax.random.normal(next(ks), (1, hidden), jnp.float32),
            mean=0.05 * jax.random.normal(next(ks), (1, hidden), jnp.float32),
            var=1.0 + 0.1 * jax.random.uniform(next(ks), (1, hidden), jnp.float32),
        ))
    return p


# -------- BN folding + packing (weights bf16, biases f32) for the kernel ---
def pack_params(params):
    """Fold eval-mode BatchNorm into the mid Linears, transpose, pack, cast."""
    mid_w, mid_b = [], []
    for m in params['mids']:
        scale = m['gamma'] * jax.lax.rsqrt(m['var'] + BN_EPS)        # (1, H)
        w_fold = m['w'] * scale                                      # (H, H)
        b_fold = (m['b'] - m['mean']) * scale + m['beta']            # (1, H)
        mid_w.append(w_fold.T)                                       # (H, H)
        mid_b.append(b_fold.T)                                       # (H, 1)
    return {
        'w_in_t': params['w_in'].T.astype(jnp.bfloat16),             # (H, IN) bf16
        'b_in_t': params['b_in'].T,                                  # (H, 1)  f32
        'mid_w_t': jnp.stack(mid_w, axis=0).astype(jnp.bfloat16),    # (n_mid, H, H) bf16
        'mid_b_t': jnp.stack(mid_b, axis=0),                         # (n_mid, H, 1) f32
        'w_out_col': params['w_out'],                                # (H, 1) f32
        'b_out': params['b_out'],                                    # (1, 1) f32
    }


# ------------------------------ Pallas kernel ------------------------------
def energy_mlp_kernel(n_mid, x_ref, w_in_ref, b_in_ref, mid_w_ref, mid_b_ref,
                      w_out_ref, b_out_ref, out_ref):
    """Fused energy MLP, transposed layout: hidden on sublanes, batch on lanes.

    x_ref     : (IN, TB)  bf16  feature tile (batch on lanes)
    w_in_ref  : (H, IN)   bf16  input Linear (transposed)
    b_in_ref  : (H, 1)    f32
    mid_w_ref : (n_mid, H, H) bf16  BN-folded mid Linears (transposed)
    mid_b_ref : (n_mid, H, 1) f32
    w_out_ref : (H, 1)    f32   output projection column
    b_out_ref : (1, 1)    f32
    out_ref   : (1, TB)   f32   lane-dense energy row
    """
    h = jnp.dot(w_in_ref[...], x_ref[...], preferred_element_type=jnp.float32)
    h = jnp.maximum(h + b_in_ref[...], 0.0)                          # (H, TB) f32

    for l in range(n_mid):
        z = jnp.dot(mid_w_ref[l, :, :], h.astype(jnp.bfloat16),
                    preferred_element_type=jnp.float32)
        h = jnp.maximum(z + mid_b_ref[l, :, :], 0.0)                 # folded BN + ReLU
        # Dropout(p=0.3) is identity in eval mode.

    # Final (H -> 1) projection: VPU multiply + sublane reduce, f32.
    e = jnp.sum(h * w_out_ref[...], axis=0, keepdims=True)           # (1, TB)
    out_ref[...] = e + b_out_ref[...]


def _round_up(x, m):
    return ((x + m - 1) // m) * m


def _choose_tiling(batch, max_tile_b=MAX_TILE_B):
    """Pick a 128-aligned lane tile; prefer >=2 grid steps for v7x megacore."""
    b128 = _round_up(max(batch, 1), 128)
    half = _round_up(pl.cdiv(b128, 2), 128)
    tile_b = min(max_tile_b, max(128, half), b128)
    b_pad = _round_up(b128, tile_b)
    return tile_b, b_pad


def pair_energy_pallas(feats_t, packed, tile_b):
    in_dim, b_pad = feats_t.shape
    hid = packed['w_in_t'].shape[0]
    n_mid = packed['mid_w_t'].shape[0]
    grid = (b_pad // tile_b,)

    in_specs = [
        pl.BlockSpec((in_dim, tile_b), lambda i: (0, i)),            # features (bf16)
        pl.BlockSpec((hid, in_dim), lambda i: (0, 0)),               # w_in_t
        pl.BlockSpec((hid, 1), lambda i: (0, 0)),                    # b_in_t
        pl.BlockSpec((n_mid, hid, hid), lambda i: (0, 0, 0)),        # mid_w_t
        pl.BlockSpec((n_mid, hid, 1), lambda i: (0, 0, 0)),          # mid_b_t
        pl.BlockSpec((hid, 1), lambda i: (0, 0)),                    # w_out_col
        pl.BlockSpec((1, 1), lambda i: (0, 0)),                      # b_out
    ]
    out_spec = pl.BlockSpec((1, tile_b), lambda i: (0, i))

    kernel = functools.partial(energy_mlp_kernel, n_mid)
    return pl.pallas_call(
        kernel,
        out_shape=jax.ShapeDtypeStruct((1, b_pad), jnp.float32),
        grid=grid,
        in_specs=in_specs,
        out_specs=out_spec,
        compiler_params=pltpu.CompilerParams(
            dimension_semantics=("parallel",),
            vmem_limit_bytes=32 * 1024 * 1024),
    )(feats_t, packed['w_in_t'], packed['b_in_t'], packed['mid_w_t'],
      packed['mid_b_t'], packed['w_out_col'], packed['b_out'])


def prepare_padded_features(x1, x2, R1, R2, max_tile_b=MAX_TILE_B):
    """Pad raw inputs to a lane-tile multiple, then build (60, B_pad) bf16 feats."""
    batch = x1.shape[0]
    tile_b, b_pad = _choose_tiling(batch, max_tile_b)
    pad = b_pad - batch
    if pad:
        # Pad the TINY raw inputs (x2 with ones so R != 0 -> finite garbage
        # columns); XLA fuses this into the feature concat, so no extra HBM
        # copy of the 60-wide feature array is ever made.
        x1 = jnp.pad(x1, ((0, pad), (0, 0)))
        x2 = jnp.pad(x2, ((0, pad), (0, 0)), constant_values=1.0)
        R1 = jnp.pad(R1, ((0, pad), (0, 0), (0, 0)))
        R2 = jnp.pad(R2, ((0, pad), (0, 0), (0, 0)))
    feats_t = prep_features_t(x1, x2, R1, R2)                        # (60, b_pad) bf16
    return feats_t, tile_b


# --------------------- single jitted dispatch (prep + kernel) --------------
@jax.jit
def pair_force_torque_forward(x1, x2, R1, R2, packed):
    batch = x1.shape[0]
    feats_t, tile_b = prepare_padded_features(x1, x2, R1, R2)
    out = pair_energy_pallas(feats_t, packed, tile_b)                # (1, b_pad)
    return out[:, :batch].T                                          # (B, 1)


# ------------------------------ JAX references ------------------------------
def pair_energy_ref(feats, params):
    """Module-faithful f32 reference (unfolded BN, eval mode)."""
    h = jnp.maximum(feats @ params['w_in'] + params['b_in'], 0.0)
    for m in params['mids']:
        z = h @ m['w'] + m['b']
        z = (z - m['mean']) / jnp.sqrt(m['var'] + BN_EPS) * m['gamma'] + m['beta']
        h = jnp.maximum(z, 0.0)
    return h @ params['w_out'] + params['b_out']


def pair_energy_ref_matched(feats_t, packed, batch):
    """Plain-JAX replica of the kernel math (bf16 streams, f32 accumulate)."""
    h = jnp.dot(packed['w_in_t'], feats_t, preferred_element_type=jnp.float32)
    h = jnp.maximum(h + packed['b_in_t'], 0.0)
    for l in range(packed['mid_w_t'].shape[0]):
        z = jnp.dot(packed['mid_w_t'][l], h.astype(jnp.bfloat16),
                    preferred_element_type=jnp.float32)
        h = jnp.maximum(z + packed['mid_b_t'][l], 0.0)
    e = jnp.sum(h * packed['w_out_col'], axis=0, keepdims=True) + packed['b_out']
    return e[:, :batch].T


# ---------------------------------- main ------------------------------------
if __name__ == "__main__":
    key = jax.random.PRNGKey(0)
    k1, k2, k3, k4, kp = jax.random.split(key, 5)

    # positions of the two particles in a pair
    x1 = 2.0 * jax.random.normal(k1, (BATCH, 3), jnp.float32)
    x2 = x1 + jax.random.normal(k2, (BATCH, 3), jnp.float32) + 0.1

    # orientation (rotation) matrices via QR of random Gaussians
    A1 = jax.random.normal(k3, (BATCH, 3, 3), jnp.float32)
    A2 = jax.random.normal(k4, (BATCH, 3, 3), jnp.float32)
    R1, _ = jnp.linalg.qr(A1)
    R2, _ = jnp.linalg.qr(A2)
    R1 = R1.astype(jnp.float32)
    R2 = R2.astype(jnp.float32)

    params = init_params(kp, IN_DIM, HIDDEN_DIM, N_LAYERS)
    packed = pack_params(params)

    energy = pair_force_torque_forward(x1, x2, R1, R2, packed)
    energy = jax.block_until_ready(energy)
    assert energy.shape == (BATCH, 1), energy.shape

    # Tight check: same math (bf16 streams / f32 accumulation) in plain JAX.
    feats_t, _ = prepare_padded_features(x1, x2, R1, R2)
    ref_matched = pair_energy_ref_matched(feats_t, packed, BATCH)
    np.testing.assert_allclose(np.asarray(energy), np.asarray(ref_matched),
                               rtol=1e-3, atol=1e-3)

    # Module-faithful f32 reference (unfolded BN). Tolerance is loosened
    # intentionally because the kernel streams features/weights in bfloat16.
    feats_ref = prep_features_rot_matrix(x1, x2, R1, R2)
    assert feats_ref.shape == (BATCH, IN_DIM), feats_ref.shape
    ref = pair_energy_ref(feats_ref, params)
    np.testing.assert_allclose(np.asarray(energy), np.asarray(ref),
                               rtol=5e-2, atol=5e-2)
    print("KERNEL_OK")
</pallas_src>

<mosaic_0001>
module attributes {stable_mosaic.version = 11 : i64} {
  func.func @energy_mlp_kernel(%arg0: i32, %arg1: memref<60x128xbf16, #tpu.memory_space<vmem>>, %arg2: memref<32x60xbf16, #tpu.memory_space<vmem>>, %arg3: memref<32x1xf32, #tpu.memory_space<vmem>>, %arg4: memref<2x32x32xbf16, #tpu.memory_space<vmem>>, %arg5: memref<2x32x1xf32, #tpu.memory_space<vmem>>, %arg6: memref<32x1xf32, #tpu.memory_space<vmem>>, %arg7: memref<1x1xf32, #tpu.memory_space<vmem>>, %arg8: memref<1x128xf32, #tpu.memory_space<vmem>>) attributes {dimension_semantics = [#tpu.dimension_semantics<parallel>], iteration_bounds = array<i64: 1>, scalar_prefetch = 0 : i64, scratch_operands = 0 : i64, tpu.core_type = #tpu.core_type<tc>, window_params = [{transform_indices = @transform_0, window_bounds = array<i64: 60, 128>}, {pipeline_mode = #tpu.pipeline_mode<synchronous>, transform_indices = @transform_1, window_bounds = array<i64: 32, 60>}, {pipeline_mode = #tpu.pipeline_mode<synchronous>, transform_indices = @transform_2, window_bounds = array<i64: 32, 1>}, {pipeline_mode = #tpu.pipeline_mode<synchronous>, transform_indices = @transform_3, window_bounds = array<i64: 2, 32, 32>}, {pipeline_mode = #tpu.pipeline_mode<synchronous>, transform_indices = @transform_4, window_bounds = array<i64: 2, 32, 1>}, {pipeline_mode = #tpu.pipeline_mode<synchronous>, transform_indices = @transform_5, window_bounds = array<i64: 32, 1>}, {pipeline_mode = #tpu.pipeline_mode<synchronous>, transform_indices = @transform_6, window_bounds = array<i64: 1, 1>}, {transform_indices = @transform_7, window_bounds = array<i64: 1, 128>}]} {
    %c0 = arith.constant 0 : index
    %c0_0 = arith.constant 0 : index
    %0 = vector.load %arg2[%c0, %c0_0] : memref<32x60xbf16, #tpu.memory_space<vmem>>, vector<32x60xbf16>
    %c0_1 = arith.constant 0 : index
    %c0_2 = arith.constant 0 : index
    %1 = vector.load %arg1[%c0_1, %c0_2] : memref<60x128xbf16, #tpu.memory_space<vmem>>, vector<60x128xbf16>
    %cst = arith.constant dense<0.000000e+00> : vector<32x128xf32>
    %2 = tpu.matmul %0, %1, %cst {dimension_numbers = #tpu.dot_dimension_numbers<[1], [0], [0], [1], [0, 0, 1, 1], [], []>} : vector<32x60xbf16>, vector<60x128xbf16>, vector<32x128xf32> -> vector<32x128xf32>
    %c0_3 = arith.constant 0 : index
    %c0_4 = arith.constant 0 : index
    %3 = vector.load %arg3[%c0_3, %c0_4] : memref<32x1xf32, #tpu.memory_space<vmem>>, vector<32x1xf32>
    %4 = vector.broadcast %3 : vector<32x1xf32> to vector<32x128xf32>
    %5 = arith.addf %2, %4 : vector<32x128xf32>
    %cst_5 = arith.constant 0.000000e+00 : f32
    %6 = vector.broadcast %cst_5 : f32 to vector<32x128xf32>
    %7 = arith.maximumf %5, %6 : vector<32x128xf32>
    %c0_6 = arith.constant 0 : index
    %c0_7 = arith.constant 0 : index
    %c0_8 = arith.constant 0 : index
    %8 = vector.load %arg4[%c0_6, %c0_7, %c0_8] : memref<2x32x32xbf16, #tpu.memory_space<vmem>>, vector<1x32x32xbf16>
    %9 = vector.shape_cast %8 : vector<1x32x32xbf16> to vector<32x32xbf16>
    %10 = arith.truncf %7 : vector<32x128xf32> to vector<32x128xbf16>
    %cst_9 = arith.constant dense<0.000000e+00> : vector<32x128xf32>
    %11 = tpu.matmul %9, %10, %cst_9 {dimension_numbers = #tpu.dot_dimension_numbers<[1], [0], [0], [1], [0, 0, 1, 1], [], []>} : vector<32x32xbf16>, vector<32x128xbf16>, vector<32x128xf32> -> vector<32x128xf32>
    %c0_10 = arith.constant 0 : index
    %c0_11 = arith.constant 0 : index
    %c0_12 = arith.constant 0 : index
    %12 = vector.load %arg5[%c0_10, %c0_11, %c0_12] : memref<2x32x1xf32, #tpu.memory_space<vmem>>, vector<1x32x1xf32>
    %13 = vector.shape_cast %12 : vector<1x32x1xf32> to vector<32x1xf32>
    %14 = vector.broadcast %13 : vector<32x1xf32> to vector<32x128xf32>
    %15 = arith.addf %11, %14 : vector<32x128xf32>
    %cst_13 = arith.constant 0.000000e+00 : f32
    %16 = vector.broadcast %cst_13 : f32 to vector<32x128xf32>
    %17 = arith.maximumf %15, %16 : vector<32x128xf32>
    %c1 = arith.constant 1 : index
    %c0_14 = arith.constant 0 : index
    %c0_15 = arith.constant 0 : index
    %18 = vector.load %arg4[%c1, %c0_14, %c0_15] : memref<2x32x32xbf16, #tpu.memory_space<vmem>>, vector<1x32x32xbf16>
    %19 = vector.shape_cast %18 : vector<1x32x32xbf16> to vector<32x32xbf16>
    %20 = arith.truncf %17 : vector<32x128xf32> to vector<32x128xbf16>
    %cst_16 = arith.constant dense<0.000000e+00> : vector<32x128xf32>
    %21 = tpu.matmul %19, %20, %cst_16 {dimension_numbers = #tpu.dot_dimension_numbers<[1], [0], [0], [1], [0, 0, 1, 1], [], []>} : vector<32x32xbf16>, vector<32x128xbf16>, vector<32x128xf32> -> vector<32x128xf32>
    %c1_17 = arith.constant 1 : index
    %c0_18 = arith.constant 0 : index
    %c0_19 = arith.constant 0 : index
    %22 = vector.load %arg5[%c1_17, %c0_18, %c0_19] : memref<2x32x1xf32, #tpu.memory_space<vmem>>, vector<1x32x1xf32>
    %23 = vector.shape_cast %22 : vector<1x32x1xf32> to vector<32x1xf32>
    %24 = vector.broadcast %23 : vector<32x1xf32> to vector<32x128xf32>
    %25 = arith.addf %21, %24 : vector<32x128xf32>
    %cst_20 = arith.constant 0.000000e+00 : f32
    %26 = vector.broadcast %cst_20 : f32 to vector<32x128xf32>
    %27 = arith.maximumf %25, %26 : vector<32x128xf32>
    %c0_21 = arith.constant 0 : index
    %c0_22 = arith.constant 0 : index
    %28 = vector.load %arg6[%c0_21, %c0_22] : memref<32x1xf32, #tpu.memory_space<vmem>>, vector<32x1xf32>
    %29 = vector.broadcast %28 : vector<32x1xf32> to vector<32x128xf32>
    %30 = arith.mulf %27, %29 : vector<32x128xf32>
    %cst_23 = arith.constant dense<0.000000e+00> : vector<128xf32>
    %31 = vector.multi_reduction <add>, %30, %cst_23 [0] : vector<32x128xf32> to vector<128xf32>
    %32 = vector.shape_cast %31 : vector<128xf32> to vector<1x128xf32>
    %c0_24 = arith.constant 0 : index
    %c0_25 = arith.constant 0 : index
    %33 = vector.load %arg7[%c0_24, %c0_25] : memref<1x1xf32, #tpu.memory_space<vmem>>, vector<1x1xf32>
    %34 = vector.broadcast %33 : vector<1x1xf32> to vector<1x128xf32>
    %35 = arith.addf %32, %34 : vector<1x128xf32>
    %c0_26 = arith.constant 0 : index
    %c0_27 = arith.constant 0 : index
    %36 = vector.load %arg8[%c0_26, %c0_27] : memref<1x128xf32, #tpu.memory_space<vmem>>, vector<1x128xf32>
    tpu.vector_store %arg8[%c0_26, %c0_27], %35 {strides = array<i32>} : memref<1x128xf32, #tpu.memory_space<vmem>>, vector<1x128xf32>,
    return
  }
  func.func @transform_0(%arg0: i32) -> (i32, i32) {
    %c0_i32 = arith.constant 0 : i32
    %c0_i32_0 = arith.constant 0 : i32
    return %c0_i32, %arg0 : i32, i32
  }
  func.func @transform_1(%arg0: i32) -> (i32, i32) {
    %c0_i32 = arith.constant 0 : i32
    %c0_i32_0 = arith.constant 0 : i32
    %c0_i32_1 = arith.constant 0 : i32
    return %c0_i32, %c0_i32_0 : i32, i32
  }
  func.func @transform_2(%arg0: i32) -> (i32, i32) {
    %c0_i32 = arith.constant 0 : i32
    %c0_i32_0 = arith.constant 0 : i32
    %c0_i32_1 = arith.constant 0 : i32
    return %c0_i32, %c0_i32_0 : i32, i32
  }
  func.func @transform_3(%arg0: i32) -> (i32, i32, i32) {
    %c0_i32 = arith.constant 0 : i32
    %c0_i32_0 = arith.constant 0 : i32
    %c0_i32_1 = arith.constant 0 : i32
    %c0_i32_2 = arith.constant 0 : i32
    return %c0_i32, %c0_i32_0, %c0_i32_1 : i32, i32, i32
  }
  func.func @transform_4(%arg0: i32) -> (i32, i32, i32) {
    %c0_i32 = arith.constant 0 : i32
    %c0_i32_0 = arith.constant 0 : i32
    %c0_i32_1 = arith.constant 0 : i32
    %c0_i32_2 = arith.constant 0 : i32
    return %c0_i32, %c0_i32_0, %c0_i32_1 : i32, i32, i32
  }
  func.func @transform_5(%arg0: i32) -> (i32, i32) {
    %c0_i32 = arith.constant 0 : i32
    %c0_i32_0 = arith.constant 0 : i32
    %c0_i32_1 = arith.constant 0 : i32
    return %c0_i32, %c0_i32_0 : i32, i32
  }
  func.func @transform_6(%arg0: i32) -> (i32, i32) {
    %c0_i32 = arith.constant 0 : i32
    %c0_i32_0 = arith.constant 0 : i32
    %c0_i32_1 = arith.constant 0 : i32
    return %c0_i32, %c0_i32_0 : i32, i32
  }
  func.func @transform_7(%arg0: i32) -> (i32, i32) {
    %c0_i32 = arith.constant 0 : i32
    %c0_i32_0 = arith.constant 0 : i32
    return %c0_i32, %arg0 : i32, i32
  }
}

</mosaic_0001>

<bundles_post_ra>
// kernel: pair_force_torque_forward.1
= control target key start
LH: loop header
LB: loop body
LE: loop exit
PB: predicated region body
PF: predicated region fallthrough
CT: control target
= control target key end

     0   :  { %v395_v0 = vmov 0   ;;  %vm105_vm0 = vcmask 1045504   ;;  %vm98_vm1 = vcmask 490496   ;;  %vm172_vm2 = vcmask 261120   ;;  %s527_s2 = inlined_call_operand.vmem [shape: f32[32,1], index: 2, kind: input, shape index: {}]   ;;  %s528_s0 = inlined_call_operand.vmem [shape: bf16[60,128], index: 0, kind: input, shape index: {}]   ;;  %s529_s6 = inlined_call_operand.<no memory space> [shape: f32[1,1], index: 6, kind: input, shape index: {}]   ;;  %s530_s4 = inlined_call_operand.vmem [shape: f32[2,32,1], index: 4, kind: input, shape index: {}]   ;;  %s531_s1 = inlined_call_operand.vmem [shape: bf16[32,60], index: 1, kind: input, shape index: {}]   ;;  %s532_s5 = inlined_call_operand.vmem [shape: f32[32,1], index: 5, kind: input, shape index: {}]   ;;  %s533_s3 = inlined_call_operand.vmem [shape: bf16[2,32,32], index: 3, kind: input, shape index: {}]   ;;  %s534_s7 = inlined_call_operand.vmem [shape: f32[1,128], index: 7, kind: output, shape index: {}]  }
   0x1   :  { %393 = vset.pattern.permute.xlu1 %v395_v0  ;;  %392 = vset.pattern.permute.xlu0 %v395_v0  ;;  %v43_v1 = vld [vmem:[%s527_s2 + $0x10] sm:$0xff]  ;;  %v41_v2 = vld [vmem:[%s527_s2] sm:$0xff]  ;;  %v345_v3 = vld [vmem:[%s528_s0 + $0x18] sm:$0xf]  ;;  %v12_v5 = vstv %s529_s6 }
   0x2   :  { %57 = vperm.xlu0 %392, %v43_v1   ;;  %47 = vperm.xlu1 %393, %v41_v2   ;;  %v382_v4 = vld [vmem:[%s528_s0 + $0x18] sm:$0x30]  ;;  %13 = vst [vmem:[#allocation2] sm:$0x1] %v12_v5  ;;  %v381_v8 = vld [vmem:[%s528_s0 + $0x10] sm:$0xff]  ;;  %v42_v10 = vld [vmem:[%s527_s2 + $0x8] sm:$0xff] }
   0x3   :  { %v346_v6 = vor.u32 %v382_v4, %v345_v3  ;;  %394 = vset.pattern.permute.xlu2 %v395_v0  ;;  %v44_v9 = vld [vmem:[%s527_s2 + $0x18] sm:$0xff]  ;;  %v380_v11 = vld [vmem:[%s528_s0 + $0x8] sm:$0xff]  ;;  %v379_v12 = vld [vmem:[%s528_s0] sm:$0xff] }
   0x4   :  { %v138_v13 = vld [vmem:[%s530_s4] sm:$0xff]  ;;  %v139_v14 = vld [vmem:[%s530_s4 + $0x8] sm:$0xff]  ;;  %v365_v18 = vld [vmem:[%s530_s4 + $0x30] sm:$0xff] }
   0x5   :  { %v107_v7 = vsel %vm105_vm0, %v346_v6, 0  ;;  %v378_v15 = vld [vmem:[%s531_s1 + $0x8] sm:$0xff]  ;;  %v377_v16 = vld [vmem:[%s531_s1] sm:$0xff]  ;;  %v276_v21 = vld [vmem:[%s532_s5 + $0x18] sm:$0xff] }
   0x6   :  { %387 = vmatpush.bf16.msra.mxu3 %v107_v7  ;;  %113 = vmatpush.bf16.msra.mxu0 %v107_v7  ;;  %v364_v17 = vld [vmem:[%s530_s4 + $0x28] sm:$0xff]  ;;  %v273_v19 = vld [vmem:[%s532_s5] sm:$0xff]  ;;  %v140_v28 = vld [vmem:[%s530_s4 + $0x10] sm:$0xff] }
   0x7   :  { %v274_v20 = vld [vmem:[%s532_s5 + $0x8] sm:$0xff]  ;;  %154 = vperm.xlu2 %394, %v140_v28   ;;  %v141_v38 = vld [vmem:[%s530_s4 + $0x18] sm:$0xff]  ;;  %v383_v43 = vld [vmem:[%s533_s3] sm:$0xff] }
   0x8   :  { %v363_v44 = vld [vmem:[%s530_s4 + $0x20] sm:$0xff]  ;;  %v366_v45 = vld [vmem:[%s530_s4 + $0x38] sm:$0xff]  ;;  %v384_v46 = vld [vmem:[%s533_s3 + $0x8] sm:$0xff] }
   0x9   :  { %v310_v22 = vld [vmem:[#allocation2] sm:$0x1]  ;;  %v275_v47 = vld [vmem:[%s532_s5 + $0x10] sm:$0xff]  ;;  %v386_v3 = vld [vmem:[%s533_s3 + $0x18] sm:$0xff] }
   0xa   :  { %388 = vmatpush.bf16.msra.mxu3 %v381_v8  ;;  %62 = vperm.xlu0 %392, %v44_v9   ;;  %v385_v2 = vld [vmem:[%s533_s3 + $0x10] sm:$0xff] }
   0xb   :  { %52 = vperm.xlu1 %393, %v42_v10   ;;  %114 = vmatpush.bf16.msra.mxu0 %v381_v8 }
   0xe   :  { %389 = vmatpush.bf16.msra.mxu3 %v380_v11 }
   0xf   :  { %115 = vmatpush.bf16.msra.mxu0 %v380_v11  ;;  %159 = vperm.xlu2 %394, %v141_v38  }
  0x12   :  { %390 = vmatpush.bf16.msra.mxu3 %v379_v12  ;;  %144 = vperm.xlu0 %392, %v138_v13  }
  0x13   :  { %149 = vperm.xlu1 %393, %v139_v14   ;;  %116 = vmatpush.bf16.msra.mxu0 %v379_v12 }
  0x15   :  { %348 = vmatmul.msk.bf16.vlgmr.msra.gmra.mxu3 %vm98_vm1, %v378_v15 }
  0x16   :  { %347 = vmatmul.msk.bf16.vlgmr.msra.gmra.mxu0 %vm98_vm1, %v377_v16 }
  0x17   :  { %216 = vperm.xlu2 %394, %v363_v44  }
  0x1a   :  { %221 = vperm.xlu0 %392, %v364_v17  }
  0x1b   :  { %226 = vperm.xlu1 %393, %v365_v18  }
  0x1f   :  { %231 = vperm.xlu2 %394, %v366_v45  }
  0x22   :  { %279 = vperm.xlu0 %392, %v273_v19  }
  0x23   :  { %284 = vperm.xlu1 %393, %v274_v20  }
  0x27   :  { %289 = vperm.xlu2 %394, %v275_v47  }
  0x2a   :  { %294 = vperm.xlu0 %392, %v276_v21  }
  0x2b   :  { %313 = vperm.xlu1 %393, %v310_v22  }
  0x61   :  { %v155_v50 = vpop.permute.xlu2 %154 }
  0x69   :  { %v160_v54 = vpop.permute.xlu2 %159 }
  0x71   :  { %v217_v5 = vpop.permute.xlu2 %216 }
  0x74   :  { %v58_v24 = vpop.permute.xlu0 %57  ;;  %v48_v25 = vpop.permute.xlu1 %47 }
  0x79   :  { %v232_v9 = vpop.permute.xlu2 %231 }
  0x7c   :  { %v63_v29 = vpop.permute.xlu0 %62 }
  0x7d   :  { %v53_v31 = vpop.permute.xlu1 %52 }
  0x81   :  { %v290_v20 = vpop.permute.xlu2 %289 }
  0x84   :  { %v145_v58 = vpop.permute.xlu0 %144 }
  0x85   :  { %v150_v52 = vpop.permute.xlu1 %149 }
  0x8c   :  { %v222_v6 = vpop.permute.xlu0 %221 }
  0x8d   :  { %v227_v8 = vpop.permute.xlu1 %226 }
  0x93   :  { %v118_v23 = vpop.f32.mrf.mxu0 }
  0x94   :  { %v119_v33 = vadd.f32 %v118_v23, %v48_v25  ;;  %v280_v14 = vpop.permute.xlu0 %279 }
  0x95   :  { %v285_v18 = vpop.permute.xlu1 %284 }
  0x96   :  { %v128_v39 = vmax.f32 %v119_v33, 0.0 }
  0x98   :  { %v123_v26 = vpop.f32.mrf.mxu3 }
  0x99   :  { %v124_v30 = vadd.f32 %v123_v26, %v58_v24 }
  0x9b   :  { %v120_v27 = vpop.f32.mrf.mxu0  ;;  %v130_v36 = vmax.f32 %v124_v30, 0.0 }
  0x9c   :  { %v121_v34 = vadd.f32 %v120_v27, %v53_v31  ;;  %v295_v27 = vpop.permute.xlu0 %294 }
  0x9e   :  { %v129_v40 = vmax.f32 %v121_v34, 0.0 }
  0xa0   :  { %v125_v32 = vpop.f32.mrf.mxu3  ;;  %v136_v42 = vpack.c.bf16 %v129_v40, %v128_v39 }
  0xa1   :  { %v126_v35 = vadd.f32 %v125_v32, %v63_v29 }
  0xa3   :  { %v131_v37 = vmax.f32 %v126_v35, 0.0  ;;  %v314_v35 = vpop.permute.xlu1 %313 }
  0xa5   :  { %v137_v41 = vpack.c.bf16 %v131_v37, %v130_v36  ;;  %v316_v37 = vperm.slane %v314_v35, 0 }
  0xa7   :  { %185 = vmatpush.bf16.msra.mxu1 %v137_v41 }
  0xab   :  { %186 = vmatpush.bf16.msra.mxu1 %v136_v42 }
  0xae   :  { %357 = vmatmul.msk.bf16.vlgmr.msra.gmra.mxu1 %vm172_vm2, %v383_v43 }
  0xbe   :  { %358 = vmatmul.msk.bf16.gmra.mxu1 %vm172_vm2, %v384_v46 }
 0x12b   :  { %v188_v48 = vpop.f32.mrf.mxu1 }
 0x12c   :  { %v189_v59 = vadd.f32 %v188_v48, %v145_v58 }
 0x12e   :  { %v198_v0 = vmax.f32 %v189_v59, 0.0 }
 0x133   :  { %v190_v49 = vpop.f32.mrf.mxu1 }
 0x134   :  { %v191_v56 = vadd.f32 %v190_v49, %v150_v52 }
 0x136   :  { %v199_v62 = vmax.f32 %v191_v56, 0.0 }
 0x138   :  { %v207_v1 = vpack.c.bf16 %v199_v62, %v198_v0 }
 0x13b   :  { %v193_v51 = vpop.f32.mrf.mxu1 }
 0x13c   :  { %v194_v53 = vadd.f32 %v193_v51, %v155_v50 }
 0x13e   :  { %v200_v60 = vmax.f32 %v194_v53, 0.0 }
 0x143   :  { %v195_v55 = vpop.f32.mrf.mxu1 }
 0x144   :  { %v196_v57 = vadd.f32 %v195_v55, %v160_v54 }
 0x146   :  { %v201_v61 = vmax.f32 %v196_v57, 0.0 }
 0x148   :  { %v208_v63 = vpack.c.bf16 %v201_v61, %v200_v60 }
 0x14a   :  { %256 = vmatpush.bf16.msra.mxu2 %v208_v63 }
 0x14e   :  { %257 = vmatpush.bf16.msra.mxu2 %v207_v1 }
 0x151   :  { %375 = vmatmul.msk.bf16.vlgmr.msra.gmra.mxu2 %vm172_vm2, %v385_v2 }
 0x161   :  { %376 = vmatmul.msk.bf16.gmra.mxu2 %vm172_vm2, %v386_v3 }
 0x1d4   :  { %v259_v4 = vpop.f32.mrf.mxu2 }
 0x1d5   :  { %v260_v12 = vadd.f32 %v259_v4, %v217_v5 }
 0x1d7   :  { %v269_v16 = vmax.f32 %v260_v12, 0.0 }
 0x1d9   :  { %v297_v22 = vmul.f32 %v280_v14, %v269_v16 }
 0x1dc   :  { %v261_v7 = vpop.f32.mrf.mxu2 }
 0x1dd   :  { %v262_v10 = vadd.f32 %v261_v7, %v222_v6 }
 0x1df   :  { %v270_v15 = vmax.f32 %v262_v10, 0.0 }
 0x1e1   :  { %v298_v19 = vmul.f32 %v285_v18, %v270_v15 }
 0x1e3   :  { %v301_v25 = vadd.f32 %v298_v19, %v297_v22 }
 0x1e4   :  { %v264_v11 = vpop.f32.mrf.mxu2 }
 0x1e5   :  { %v265_v13 = vadd.f32 %v264_v11, %v227_v8 }
 0x1e7   :  { %v271_v17 = vmax.f32 %v265_v13, 0.0 }
 0x1e9   :  { %v299_v23 = vmul.f32 %v290_v20, %v271_v17 }
 0x1eb   :  { %v302_v28 = vadd.f32 %v301_v25, %v299_v23 }
 0x1ec   :  { %v266_v21 = vpop.f32.mrf.mxu2 }
 0x1ed   :  { %v267_v24 = vadd.f32 %v266_v21, %v232_v9 }
 0x1ef   :  { %v272_v26 = vmax.f32 %v267_v24, 0.0 }
 0x1f1   :  { %v300_v29 = vmul.f32 %v295_v27, %v272_v26 }
 0x1f3   :  { %v303_v30 = vadd.f32 %v302_v28, %v300_v29 }
 0x1f5   :  { %v304_v31 = vrot.slane %v303_v30, 4 }
 0x1f7   :  { %v305_v32 = vadd.f32 %v304_v31, %v303_v30 }
 0x1f9   :  { %v306_v33 = vrot.slane %v305_v32, 2 }
 0x1fb   :  { %v307_v34 = vadd.f32 %v306_v33, %v305_v32 }
 0x1fd   :  { %v308_v36 = vrot.slane %v307_v34, 1 }
 0x1ff   :  { %v309_v38 = vadd.f32 %v308_v36, %v307_v34 }
 0x201   :  { %v317_v39 = vadd.f32 %v316_v37, %v309_v38 }
 0x203   :  { %318 = vst [vmem:[%s534_s7] sm:$0x1] %v317_v39 }

</bundles_post_ra>
